<compile_context>
chip_gen: v7x
topology: tpu7x:2x2x1
jax: 0.10.0
libtpu: 0.0.40
codegen_flags: <defaults>
</compile_context>

<pallas_src>
import functools

import jax
import jax.numpy as jnp
from jax.experimental import pallas as pl
from jax.experimental.pallas import tpu as pltpu

ALPHA = 0.25
GAMMA = 2.0
EPS = 1e-8

LANES = 128
SUBLANES = 8
ACC_ROWS_MAX = 64        # (64,128) f32 accumulator = 8 vregs -> VALU ILP
MAX_BLOCK_ROWS = 2048    # 2048x128 f32 tile = 1 MiB/stream; 2 streams x 2 bufs
                         # + ~6 block-wide temporaries ~= 10-12 MiB < 32 MiB


def _cdiv(a, b):
    return (a + b - 1) // b


def _round_up(a, b):
    return _cdiv(a, b) * b


def _focal_elementwise(x, t, alpha, gamma):
    """Reference-exact per-element focal loss, f32 math, 2 EUP ops/elem."""
    x = x.astype(jnp.float32)
    t = t.astype(jnp.float32)
    # sigmoid via tanh: one EUP transcendental instead of exp + divide.
    p = 0.5 * jnp.tanh(0.5 * x) + 0.5
    p_t = p * t + (1.0 - p) * (1.0 - t)
    q = 1.0 - p_t
    if gamma == 2:            # module default: two VPU muls, no pow (exp+log)
        mod = q * q
    elif gamma == 1:
        mod = q
    else:                     # generic path: clamp so pow's internal log is safe
        mod = jnp.maximum(q, 0.0) ** gamma
    return (-alpha) * mod * jnp.log(p_t + EPS)


def _focal_loss_kernel(x_ref, t_ref, o_ref, acc_ref, *, alpha, gamma,
                       total_rows, block_rows, acc_rows, steps):
    c = pl.program_id(0)   # parallel chunk (one per TensorCore on v7x)
    s = pl.program_id(1)   # reduction step inside the chunk

    @pl.when(s == 0)
    def _():
        acc_ref[...] = jnp.zeros_like(acc_ref)

    focal = _focal_elementwise(x_ref[...], t_ref[...], alpha, gamma)

    def _fold(f):
        # Fold the block into the (acc_rows, LANES) accumulator with plain
        # vector adds over the leading dim (no cross-lane XLU work in-loop).
        return f.reshape(-1, acc_rows, LANES).sum(axis=0)

    if total_rows % block_rows == 0:
        # Every block is fully in-bounds: no mask code emitted at all.
        acc_ref[...] += _fold(focal)
    else:
        blk = c * steps + s
        row0 = blk * block_rows
        is_edge = row0 + block_rows > total_rows

        @pl.when(jnp.logical_not(is_edge))
        def _():
            acc_ref[...] += _fold(focal)

        @pl.when(is_edge)
        def _():
            # Only the single ragged edge block pays for the row mask; the
            # garbage rows DMA'd past the array end are zeroed before the add.
            row = jax.lax.broadcasted_iota(jnp.int32, (block_rows, LANES), 0)
            valid = (row0 + row) < total_rows
            acc_ref[...] += _fold(jnp.where(valid, focal, 0.0))

    @pl.when(s == steps - 1)
    def _():
        o_ref[...] = acc_ref[...]


def _focal_sum_main(x2, t2, alpha, gamma):
    """Sum of per-element focal loss over a (rows, 128) layout via Pallas."""
    rows = x2.shape[0]

    acc_rows = min(ACC_ROWS_MAX, _round_up(rows, SUBLANES))
    block_rows = min(MAX_BLOCK_ROWS, _round_up(rows, acc_rows))
    num_blocks = _cdiv(rows, block_rows)

    # 2-chunk "parallel" axis (one chunk per TensorCore on v7x), only when it
    # covers the grid exactly; on 1-TC chips dimension_semantics has near-zero
    # measured effect, so an odd block count just runs as a single chunk.
    n_par = 2 if (num_blocks >= 2 and num_blocks % 2 == 0) else 1
    steps = num_blocks // n_par

    kernel = functools.partial(
        _focal_loss_kernel, alpha=float(alpha), gamma=gamma,
        total_rows=rows, block_rows=block_rows, acc_rows=acc_rows, steps=steps)

    in_spec = pl.BlockSpec((block_rows, LANES), lambda c, s: (c * steps + s, 0))

    partials = pl.pallas_call(
        kernel,
        out_shape=jax.ShapeDtypeStruct((n_par * acc_rows, LANES), jnp.float32),
        grid_spec=pltpu.PrefetchScalarGridSpec(
            num_scalar_prefetch=0,
            grid=(n_par, steps),
            in_specs=[in_spec, in_spec],
            out_specs=pl.BlockSpec((acc_rows, LANES), lambda c, s: (c, 0)),
            scratch_shapes=[pltpu.VMEM((acc_rows, LANES), jnp.float32)],
        ),
        compiler_params=pltpu.CompilerParams(
            dimension_semantics=("parallel", "arbitrary"),
            vmem_limit_bytes=32 * 1024 * 1024),
    )(x2, t2)

    return jnp.sum(partials)   # single tiny cross-lane reduce, done by XLA


def binary_focal_loss(inputs, targets, alpha=ALPHA, gamma=GAMMA,
                      reduction="mean"):
    """Pallas TPU implementation of BinaryFocalLoss.forward ('mean'/'sum')."""
    n = inputs.size
    assert n > 0

    # Keep the caller's dtype on the way in (no wrapper upcast -> no extra
    # HBM pass); the kernel casts to f32 in VMEM.
    flat_x = jnp.ravel(inputs)
    flat_t = jnp.ravel(targets)

    rows = n // LANES
    n_main = rows * LANES
    rem = n - n_main

    total = jnp.zeros((), jnp.float32)
    if rows > 0:
        if rem == 0:
            x2 = flat_x.reshape(rows, LANES)   # pure bitcast, zero copy
            t2 = flat_t.reshape(rows, LANES)
        else:
            # Rare non-lane-aligned case: slice the aligned prefix (at worst
            # one copy of the prefix — still cheaper than padding both full
            # streams out past a block boundary as before).
            x2 = flat_x[:n_main].reshape(rows, LANES)
            t2 = flat_t[:n_main].reshape(rows, LANES)
        total = total + _focal_sum_main(x2, t2, alpha, gamma)
    if rem > 0:
        # Ragged sub-row tail (< 128 elements): trivial XLA epilogue.
        total = total + jnp.sum(
            _focal_elementwise(flat_x[n_main:], flat_t[n_main:],
                               float(alpha), gamma))

    if reduction == "sum":
        return total
    if reduction == "mean":
        return total / jnp.float32(n)
    # TODO(synk): 'none' reduction (per-element output) not implemented here.
    raise NotImplementedError("reduction must be 'mean' or 'sum'")


def _reference(inputs, targets, alpha=ALPHA, gamma=GAMMA):
    p = jax.nn.sigmoid(inputs.astype(jnp.float32))
    t = targets.astype(jnp.float32)
    p_t = p * t + (1 - p) * (1 - t)
    fl = -alpha * (1 - p_t) ** gamma * jnp.log(p_t + EPS)
    return jnp.mean(fl)


if __name__ == "__main__":
    key = jax.random.PRNGKey(0)
    k1, k2 = jax.random.split(key)
    # NCHW-shaped logits and binary targets.
    x = jax.random.normal(k1, (2, 4, 16, 16), dtype=jnp.float32)
    tgt = (jax.random.uniform(k2, (2, 4, 16, 16)) > 0.5).astype(jnp.float32)

    loss = binary_focal_loss(x, tgt)
    loss = jax.block_until_ready(loss)

    ref = _reference(x, tgt)
    assert jnp.allclose(loss, ref, rtol=1e-5, atol=1e-6), (loss, ref)
    print("KERNEL_OK")
</pallas_src>

<mosaic_0001>
module attributes {stable_mosaic.version = 11 : i64} {
  func.func @_focal_loss_kernel(%arg0: i32, %arg1: i32, %arg2: memref<16x128xf32, #tpu.memory_space<vmem>>, %arg3: memref<16x128xf32, #tpu.memory_space<vmem>>, %arg4: memref<16x128xf32, #tpu.memory_space<vmem>>, %arg5: memref<16x128xf32, #tpu.memory_space<vmem>>) attributes {dimension_semantics = [#tpu.dimension_semantics<parallel>, #tpu.dimension_semantics<arbitrary>], iteration_bounds = array<i64: 1, 1>, scalar_prefetch = 0 : i64, scratch_operands = 1 : i64, tpu.core_type = #tpu.core_type<tc>, window_params = [{transform_indices = @transform_0, window_bounds = array<i64: 16, 128>}, {transform_indices = @transform_1, window_bounds = array<i64: 16, 128>}, {transform_indices = @transform_2, window_bounds = array<i64: 16, 128>}]} {
    %c0_i32 = arith.constant 0 : i32
    %0 = arith.cmpi eq, %arg1, %c0_i32 : i32
    %1 = arith.extui %0 : i1 to i32
    %c0_i32_0 = arith.constant 0 : i32
    %2 = arith.cmpi ne, %1, %c0_i32_0 : i32
    scf.if %2 {
      %cst_18 = arith.constant 0.000000e+00 : f32
      %36 = vector.broadcast %cst_18 : f32 to vector<16x128xf32>
      %c0_19 = arith.constant 0 : index
      %c0_20 = arith.constant 0 : index
      %37 = vector.load %arg5[%c0_19, %c0_20] : memref<16x128xf32, #tpu.memory_space<vmem>>, vector<16x128xf32>
      tpu.vector_store %arg5[%c0_19, %c0_20], %36 {strides = array<i32>} : memref<16x128xf32, #tpu.memory_space<vmem>>, vector<16x128xf32>,
    } else {
    }
    %c0 = arith.constant 0 : index
    %c0_1 = arith.constant 0 : index
    %3 = vector.load %arg2[%c0, %c0_1] : memref<16x128xf32, #tpu.memory_space<vmem>>, vector<16x128xf32>
    %c0_2 = arith.constant 0 : index
    %c0_3 = arith.constant 0 : index
    %4 = vector.load %arg3[%c0_2, %c0_3] : memref<16x128xf32, #tpu.memory_space<vmem>>, vector<16x128xf32>
    %cst = arith.constant 5.000000e-01 : f32
    %5 = vector.broadcast %cst : f32 to vector<16x128xf32>
    %6 = arith.mulf %5, %3 : vector<16x128xf32>
    %7 = math.tanh %6 : vector<16x128xf32>
    %cst_4 = arith.constant 5.000000e-01 : f32
    %8 = vector.broadcast %cst_4 : f32 to vector<16x128xf32>
    %9 = arith.mulf %8, %7 : vector<16x128xf32>
    %cst_5 = arith.constant 5.000000e-01 : f32
    %10 = vector.broadcast %cst_5 : f32 to vector<16x128xf32>
    %11 = arith.addf %9, %10 : vector<16x128xf32>
    %12 = arith.mulf %11, %4 : vector<16x128xf32>
    %cst_6 = arith.constant 1.000000e+00 : f32
    %13 = vector.broadcast %cst_6 : f32 to vector<16x128xf32>
    %14 = arith.subf %13, %11 : vector<16x128xf32>
    %cst_7 = arith.constant 1.000000e+00 : f32
    %15 = vector.broadcast %cst_7 : f32 to vector<16x128xf32>
    %16 = arith.subf %15, %4 : vector<16x128xf32>
    %17 = arith.mulf %14, %16 : vector<16x128xf32>
    %18 = arith.addf %12, %17 : vector<16x128xf32>
    %cst_8 = arith.constant 1.000000e+00 : f32
    %19 = vector.broadcast %cst_8 : f32 to vector<16x128xf32>
    %20 = arith.subf %19, %18 : vector<16x128xf32>
    %21 = arith.mulf %20, %20 : vector<16x128xf32>
    %cst_9 = arith.constant -2.500000e-01 : f32
    %22 = vector.broadcast %cst_9 : f32 to vector<16x128xf32>
    %23 = arith.mulf %22, %21 : vector<16x128xf32>
    %cst_10 = arith.constant 9.99999993E-9 : f32
    %24 = vector.broadcast %cst_10 : f32 to vector<16x128xf32>
    %25 = arith.addf %18, %24 : vector<16x128xf32>
    %26 = math.log %25 : vector<16x128xf32>
    %27 = arith.mulf %23, %26 : vector<16x128xf32>
    %c0_11 = arith.constant 0 : index
    %c0_12 = arith.constant 0 : index
    %28 = vector.load %arg5[%c0_11, %c0_12] : memref<16x128xf32, #tpu.memory_space<vmem>>, vector<16x128xf32>
    %29 = vector.shape_cast %27 : vector<16x128xf32> to vector<1x16x128xf32>
    %cst_13 = arith.constant dense<0.000000e+00> : vector<16x128xf32>
    %30 = vector.multi_reduction <add>, %29, %cst_13 [0] : vector<1x16x128xf32> to vector<16x128xf32>
    %31 = arith.addf %28, %30 : vector<16x128xf32>
    %c0_14 = arith.constant 0 : index
    %c0_15 = arith.constant 0 : index
    %32 = vector.load %arg5[%c0_14, %c0_15] : memref<16x128xf32, #tpu.memory_space<vmem>>, vector<16x128xf32>
    tpu.vector_store %arg5[%c0_14, %c0_15], %31 {strides = array<i32>} : memref<16x128xf32, #tpu.memory_space<vmem>>, vector<16x128xf32>,
    %c0_i32_16 = arith.constant 0 : i32
    %33 = arith.cmpi eq, %arg1, %c0_i32_16 : i32
    %34 = arith.extui %33 : i1 to i32
    %c0_i32_17 = arith.constant 0 : i32
    %35 = arith.cmpi ne, %34, %c0_i32_17 : i32
    scf.if %35 {
      %c0_18 = arith.constant 0 : index
      %c0_19 = arith.constant 0 : index
      %36 = vector.load %arg5[%c0_18, %c0_19] : memref<16x128xf32, #tpu.memory_space<vmem>>, vector<16x128xf32>
      %c0_20 = arith.constant 0 : index
      %c0_21 = arith.constant 0 : index
      %37 = vector.load %arg4[%c0_20, %c0_21] : memref<16x128xf32, #tpu.memory_space<vmem>>, vector<16x128xf32>
      tpu.vector_store %arg4[%c0_20, %c0_21], %36 {strides = array<i32>} : memref<16x128xf32, #tpu.memory_space<vmem>>, vector<16x128xf32>,
    } else {
    }
    return
  }
  func.func @transform_0(%arg0: i32, %arg1: i32) -> (i32, i32) {
    %c1_i32 = arith.constant 1 : i32
    %0 = arith.muli %arg0, %c1_i32 : i32
    %1 = arith.addi %0, %arg1 : i32
    %c0_i32 = arith.constant 0 : i32
    %c0_i32_0 = arith.constant 0 : i32
    return %1, %c0_i32 : i32, i32
  }
  func.func @transform_1(%arg0: i32, %arg1: i32) -> (i32, i32) {
    %c1_i32 = arith.constant 1 : i32
    %0 = arith.muli %arg0, %c1_i32 : i32
    %1 = arith.addi %0, %arg1 : i32
    %c0_i32 = arith.constant 0 : i32
    %c0_i32_0 = arith.constant 0 : i32
    return %1, %c0_i32 : i32, i32
  }
  func.func @transform_2(%arg0: i32, %arg1: i32) -> (i32, i32) {
    %c0_i32 = arith.constant 0 : i32
    %c0_i32_0 = arith.constant 0 : i32
    return %arg0, %c0_i32 : i32, i32
  }
}

</mosaic_0001>

<bundles_post_ra>
// kernel: tpu_custom_call.1
= control target key start
LH: loop header
LB: loop body
LE: loop exit
PB: predicated region body
PF: predicated region fallthrough
CT: control target
= control target key end

     0   :  { %7 = vsyncpa [#allocation4], 0  ;;  %s277_s0 = inlined_call_operand.hbm [shape: f32[16,128], index: 0, kind: input, shape index: {}]   ;;  %s278_s1 = inlined_call_operand.hbm [shape: f32[16,128], index: 1, kind: input, shape index: {}]   ;;  %s279_s2 = inlined_call_operand.hbm [shape: f32[16,128], index: 2, kind: output, shape index: {}]  }
   0x1   :  { %8 = vsyncpa [#allocation7], 0 }
   0x2   :  { %9 = vsyncpa [#allocation5], 0  ;;  %s212_s9 = smov [#allocation3]   ;;  %s140_s13 = scalar_lea.hbm %s277_s0, 256 }
   0x3   :  { %s19_s10 = sshll.u32 %s212_s9, 4  ;;  %p141_p0 = scmp.ne.s32.totalorder %s277_s0, %s140_s13  ;;  %s20_s10 = int_to_ptr.vmem [resolvable:$true] %s19_s10 }
   0x4   :  { %p144_p1 = scmp.lt.u32.totalorder %s140_s13, %s277_s0 }
   0x6   :  { %p146_p2 = pnand %p144_p1, %p141_p0 }
   0x8   :  { %149 = shalt.err (!%p146_p2)
}
   0x9   :  { %s150_s18 = scalar_lea.vmem %s20_s10, 256  ;;  %p155_p4 = scmp.lt.s32.totalorder %s20_s10, %s20_s10 }
   0xa   :  { %p151_p3 = scmp.ne.s32.totalorder %s20_s10, %s150_s18  ;;  %p156_p5 = scmp.lt.s32.totalorder %s150_s18, %s150_s18 }
   0xc   :  { %p157_p6 = por %p156_p5, %p155_p4 }
   0xe   :  { %p158_p7 = pnand %p157_p6, %p151_p3 }
  0x10   :  { %161 = shalt.err (!%p158_p7)
}
  0x11   :  { %s213_s19 = smov 128   ;;  %s214_s20 = smov 8  }
  0x12   :  { %25 = dma.hbm_to_vmem [thread:$0]  %s277_s0, 256, %s20_s10, [#allocation4], %s213_s19, %s213_s19, %s214_s20  }
  0x13   :  { %s215_s23 = smov [#allocation6]   ;;  %s162_s27 = scalar_lea.hbm %s278_s1, 256 }
  0x14   :  { %s35_s24 = sshll.u32 %s215_s23, 4  ;;  %p163_p8 = scmp.ne.s32.totalorder %s278_s1, %s162_s27  ;;  %s36_s24 = int_to_ptr.vmem [resolvable:$true] %s35_s24 }
  0x15   :  { %p166_p9 = scmp.lt.u32.totalorder %s162_s27, %s278_s1 }
  0x17   :  { %p168_p10 = pnand %p166_p9, %p163_p8 }
  0x19   :  { %171 = shalt.err (!%p168_p10)
}
  0x1a   :  { %s172_s4 = scalar_lea.vmem %s36_s24, 256  ;;  %p177_p12 = scmp.lt.s32.totalorder %s36_s24, %s36_s24 }
  0x1b   :  { %p173_p11 = scmp.ne.s32.totalorder %s36_s24, %s172_s4  ;;  %p178_p13 = scmp.lt.s32.totalorder %s172_s4, %s172_s4 }
  0x1d   :  { %p179_p0 = por %p178_p13, %p177_p12 }
  0x1f   :  { %p180_p1 = pnand %p179_p0, %p173_p11 }
  0x21   :  { %183 = shalt.err (!%p180_p1)
}
  0x22   :  { %41 = dma.hbm_to_vmem [thread:$0]  %s278_s1, 256, %s36_s24, [#allocation7], %s213_s19, %s213_s19, %s214_s20  }
  0x23   :  { %206 = dma.done.wait [#allocation4], 256  }
  0x24   :  { %207 = vsyncadd [#allocation4], 4294967040 }
  0x25   :  { %208 = dma.done.wait [#allocation7], 256  }
  0x26   :  { %209 = vsyncadd [#allocation7], 4294967040  ;;  %v58_v0 = vld [vmem:[#allocation3] sm:$0xff]  ;;  %v59_v1 = vld [vmem:[#allocation3 + $0x8] sm:$0xff]  ;;  %s216_s1 = smov [#allocation8]  }
  0x27   :  { %v62_v2 = vmul.f32 0.5, %v58_v0  ;;  %v63_v3 = vmul.f32 0.5, %v59_v1  ;;  %v60_v5 = vld [vmem:[#allocation6] sm:$0xff]  ;;  %v61_v8 = vld [vmem:[#allocation6 + $0x8] sm:$0xff]  ;;  %s114_s6 = sshll.u32 %s216_s1, 4  ;;  %s115_s6 = int_to_ptr.vmem [resolvable:$true] %s114_s6 }
  0x28   :  { %v74_v11 = vsub.f32 1.0, %v60_v5  ;;  %v75_v13 = vsub.f32 1.0, %v61_v8  ;;  %s184_s7 = scalar_lea.vmem %s115_s6, 256  ;;  %p189_p3 = scmp.lt.s32.totalorder %s115_s6, %s115_s6 }
  0x29   :  { %132 = vtanh.f32 %v62_v2  ;;  %p185_p2 = scmp.ne.s32.totalorder %s115_s6, %s184_s7  ;;  %p190_p4 = scmp.lt.s32.totalorder %s184_s7, %s184_s7 }
  0x2a   :  { %134 = vtanh.f32 %v63_v3 }
  0x2b   :  { %p191_p5 = por %p190_p4, %p189_p3 }
  0x2d   :  { %p192_p6 = pnand %p191_p5, %p185_p2 }
  0x33   :  { %v133_v4 = vpop.eup %132 }
  0x34   :  { %v135_v6 = vpop.eup %134  ;;  %v66_v7 = vmul.f32 0.5, %v133_v4 }
  0x35   :  { %v67_v9 = vmul.f32 0.5, %v135_v6 }
  0x36   :  { %v68_v10 = vadd.f32 0.5, %v66_v7 }
  0x37   :  { %v69_v12 = vadd.f32 0.5, %v67_v9 }
  0x38   :  { %v70_v14 = vmul.f32 %v68_v10, %v60_v5  ;;  %v72_v15 = vsub.f32 1.0, %v68_v10 }
  0x39   :  { %v71_v16 = vmul.f32 %v69_v12, %v61_v8  ;;  %v73_v17 = vsub.f32 1.0, %v69_v12 }
  0x3a   :  { %v76_v18 = vmul.f32 %v74_v11, %v72_v15 }
  0x3b   :  { %v77_v19 = vmul.f32 %v75_v13, %v73_v17 }
  0x3c   :  { %v78_v20 = vadd.f32 %v76_v18, %v70_v14 }
  0x3d   :  { %v79_v21 = vadd.f32 %v77_v19, %v71_v16 }
  0x3e   :  { %v86_v22 = vadd.f32 1e-08, %v78_v20  ;;  %v80_v24 = vsub.f32 1.0, %v78_v20 }
  0x3f   :  { %v87_v23 = vadd.f32 1e-08, %v79_v21  ;;  %v81_v25 = vsub.f32 1.0, %v79_v21 }
  0x40   :  { %136 = vlog2.f32 %v86_v22  ;;  %v82_v26 = vmul.f32 %v80_v24, %v80_v24 }
  0x41   :  { %138 = vlog2.f32 %v87_v23  ;;  %v83_v27 = vmul.f32 %v81_v25, %v81_v25 }
  0x42   :  { %v84_v28 = vmul.f32 -0.25, %v82_v26 }
  0x43   :  { %v85_v30 = vmul.f32 -0.25, %v83_v27 }
  0x4a   :  { %v137_v29 = vpop.eup %136 }
  0x4b   :  { %v139_v31 = vpop.eup %138  ;;  %v89_v32 = vmul.f32 0.6931472, %v137_v29 }
  0x4c   :  { %v91_v33 = vmul.f32 0.6931472, %v139_v31 }
  0x4d   :  { %v92_v34 = vmul.f32 %v89_v32, %v84_v28 }
  0x4e   :  { %v93_v35 = vmul.f32 %v91_v33, %v85_v30 }
  0x4f   :  { %107 = vst [vmem:[#allocation8] sm:$0xff] %v92_v34 }
  0x50   :  { %108 = vst [vmem:[#allocation8 + $0x8] sm:$0xff] %v93_v35 }
  0x51   :  { %195 = shalt.err (!%p192_p6)
}
  0x52   :  { %s196_s10 = scalar_lea.hbm %s279_s2, 256 }
  0x53   :  { %p197_p7 = scmp.ne.s32.totalorder %s279_s2, %s196_s10  ;;  %p200_p8 = scmp.lt.u32.totalorder %s196_s10, %s279_s2 }
  0x55   :  { %p202_p9 = pnand %p200_p8, %p197_p7 }
  0x57   :  { %205 = shalt.err (!%p202_p9)
}
  0x58   :  { %120 = dma.vmem_to_hbm [thread:$0]  %s115_s6, 256, %s279_s2, [#allocation5], %s213_s19, %s213_s19, %s214_s20  }
  0x59   :  { %210 = dma.done.wait [#allocation5], 256  }
  0x5a   :  { %211 = vsyncadd [#allocation5], 4294967040 }
  0x5b   :  { %124 = vsyncpa [#allocation4], 1 }
  0x5c   :  { %125 = vsyncpa [#allocation7], 1 }
  0x5d   :  { %126 = vsyncpa [#allocation5], 1 }

</bundles_post_ra>
